<compile_context>
chip_gen: v5e
topology: v5e:2x2
jax: 0.10.0
libtpu: 0.0.40
codegen_flags: <defaults>
</compile_context>

<pallas_src>
import functools

import jax
import jax.numpy as jnp
from jax.experimental import pallas as pl
from jax.experimental.pallas import tpu as pltpu

LANE = 128      # vreg lane width
SUBLANE = 8     # vreg sublane count (f32)


def _round_up(n, m):
    return ((n + m - 1) // m) * m


def fused_rnn_seq_kernel(h0_ref, x_ref, w_in_ref, w_hh_ref, b_ref, out_ref, h_ref):
    """One time step of the fused RNN sequence; grid axis 0 = time (sequential).

    h0_ref  : [Bp, Hp]     f32   initial hidden state (resident)
    x_ref   : [1, Bp, Ip]  bf16  input tile for step t (streamed per grid step)
    w_in_ref: [Ip, Hp]     bf16  input weights (resident)
    w_hh_ref: [Hp, Hp]     bf16  recurrent weights (resident)
    b_ref   : [1, Hp]      f32   bias (resident)
    out_ref : [1, Bp, Hp]  f32   tanh output for step t (lane-dense, pipelined writeback)
    h_ref   : [Bp, Hp]     f32   persistent VMEM scratch carrying the hidden state
    """
    t = pl.program_id(0)

    @pl.when(t == 0)
    def _():
        h_ref[...] = h0_ref[...]

    x_t = x_ref[0]                                  # (Bp, Ip) bf16
    h_t = h_ref[...].astype(w_hh_ref.dtype)         # cast matmul operand only; state stays f32
    acc = jnp.dot(x_t, w_in_ref[...], preferred_element_type=jnp.float32)
    acc += jnp.dot(h_t, w_hh_ref[...], preferred_element_type=jnp.float32)
    acc += b_ref[...]                               # f32 bias, broadcast over batch rows
    out = jnp.tanh(acc)                             # f32 tanh on the EUP (SIMPLE model path)
    out_ref[0] = out
    h_ref[...] = out                                # fed back as next-step hidden (f32)


def pack_params(w_in, w_hh, b, matmul_dtype=jnp.bfloat16):
    """Zero-pad weights/bias to lane-aligned shapes, once per parameter update.

    w_in: [I, H], w_hh: [H, H], b: [1, H]  (already transposed vs torch's [out, in]).
    """
    I, H = w_in.shape
    Ip, Hp = _round_up(I, LANE), _round_up(H, LANE)
    w_in_p = jnp.zeros((Ip, Hp), matmul_dtype).at[:I, :H].set(w_in.astype(matmul_dtype))
    w_hh_p = jnp.zeros((Hp, Hp), matmul_dtype).at[:H, :H].set(w_hh.astype(matmul_dtype))
    b_p = jnp.zeros((1, Hp), jnp.float32).at[:, :H].set(b.reshape(1, -1).astype(jnp.float32))
    return w_in_p, w_hh_p, b_p


@functools.partial(jax.jit, static_argnames=("hidden_size",))
def model_layer_sequence_forward(x_seq, h0, w_in_p, w_hh_p, b_p, hidden_size):
    """Fused multi-step forward: applies ModelLayer.forward for every t in one pallas_call.

    x_seq : [T, B, input_size]   inputs for every time step
    h0    : [B, hidden_size]     hidden state before the first step
    Returns (out_seq[T, B, H], None, neuron_hidden) mirroring the torch module per step.
    """
    T, B, I = x_seq.shape
    H = hidden_size
    Ip, Hp = w_in_p.shape
    Bp = _round_up(B, SUBLANE)
    mm_dtype = w_in_p.dtype

    # Pad/cast once for the WHOLE sequence (not per step).
    x_pad = jnp.zeros((T, Bp, Ip), mm_dtype).at[:, :B, :I].set(x_seq.astype(mm_dtype))
    h0_pad = jnp.zeros((Bp, Hp), jnp.float32).at[:B, :H].set(h0.astype(jnp.float32))

    out_pad = pl.pallas_call(
        fused_rnn_seq_kernel,
        out_shape=jax.ShapeDtypeStruct((T, Bp, Hp), jnp.float32),
        grid_spec=pltpu.PrefetchScalarGridSpec(
            num_scalar_prefetch=0,
            grid=(T,),
            in_specs=[
                pl.BlockSpec((Bp, Hp), lambda t: (0, 0)),        # h0   (resident)
                pl.BlockSpec((1, Bp, Ip), lambda t: (t, 0, 0)),  # x_t  (streamed per step)
                pl.BlockSpec((Ip, Hp), lambda t: (0, 0)),        # W_in (resident)
                pl.BlockSpec((Hp, Hp), lambda t: (0, 0)),        # W_hh (resident)
                pl.BlockSpec((1, Hp), lambda t: (0, 0)),         # bias (resident)
            ],
            out_specs=pl.BlockSpec((1, Bp, Hp), lambda t: (t, 0, 0)),
            scratch_shapes=[pltpu.VMEM((Bp, Hp), jnp.float32)],  # persistent hidden state
        ),
        compiler_params=pltpu.CompilerParams(dimension_semantics=("arbitrary",)),
    )(h0_pad, x_pad, w_in_p, w_hh_p, b_p)

    out = out_pad[:, :B, :H]        # single slice per sequence, not per step
    # SIMPLE model path in apply_complexity returns tuple(torch.zeros(0)) as neuron hidden.
    neuron_hidden = (jnp.zeros((0,), jnp.float32),)
    # return_recurrent_state defaults to False -> second element is None.
    # TODO(synk): neuron_model (shared complexity DNN) path not implemented (neuron_model=None).
    return out, None, neuron_hidden


def model_layer_forward(x, h, w_in_p, w_hh_p, b_p, hidden_size):
    """Single-time-step forward matching the torch module signature (T=1 of the fused kernel)."""
    out_seq, rnn_state, neuron_hidden = model_layer_sequence_forward(
        x[None], h, w_in_p, w_hh_p, b_p, hidden_size)
    return out_seq[0], rnn_state, neuron_hidden


def make_params(key, input_size, hidden_size):
    """Deterministic parameter construction emulating CustomRNNCell init +
    WeightConstraint.apply (exc/inh sign constraints)."""
    k1, k2, k3 = jax.random.split(key, 3)
    scale = 1.0 / jnp.sqrt(hidden_size)
    w_in = jax.random.uniform(k1, (input_size, hidden_size), jnp.float32,
                              minval=-scale, maxval=scale)
    w_hh = jax.random.uniform(k2, (hidden_size, hidden_size), jnp.float32,
                              minval=-scale, maxval=scale)
    b = jax.random.uniform(k3, (1, hidden_size), jnp.float32,
                           minval=-scale, maxval=scale)
    # Input constraints: first half of inputs excitatory (w >= 0), second half inhibitory (w <= 0).
    half = input_size // 2
    w_in = jnp.concatenate([jnp.abs(w_in[:half]), -jnp.abs(w_in[half:])], axis=0)
    # Layer is excitatory (e.g. V1_Exc_L4): recurrent weights non-negative.
    w_hh = jnp.abs(w_hh)
    return w_in, w_hh, b


if __name__ == "__main__":
    T = 8
    batch = 8
    input_size = 32
    hidden_size = 32

    key = jax.random.PRNGKey(0)
    kx, kh, kp = jax.random.split(key, 3)
    x_seq = jax.random.normal(kx, (T, batch, input_size), jnp.float32)
    h0 = jax.random.normal(kh, (batch, hidden_size), jnp.float32)
    w_in, w_hh, b = make_params(kp, input_size, hidden_size)

    # Pack (and pad) weights once; reused across every time step / sequence.
    w_in_p, w_hh_p, b_p = pack_params(w_in, w_hh, b, matmul_dtype=jnp.bfloat16)

    # Fused full-sequence forward (one pallas_call for all T steps).
    out_seq, rnn_state, neuron_hidden = model_layer_sequence_forward(
        x_seq, h0, w_in_p, w_hh_p, b_p, hidden_size)
    out_seq = jax.block_until_ready(out_seq)

    # Single-step forward (torch-module signature), reusing the same kernel with T=1.
    out_step, _, _ = model_layer_forward(x_seq[0], h0, w_in_p, w_hh_p, b_p, hidden_size)
    out_step = jax.block_until_ready(out_step)

    # Pure-JAX reference loop mirroring per-step ModelLayer.forward with the same
    # bf16-matmul / f32-accumulate / f32-state casting discipline as the kernel.
    w_in_bf, w_hh_bf = w_in.astype(jnp.bfloat16), w_hh.astype(jnp.bfloat16)

    def ref_step(h, x_t):
        pre = (jnp.dot(x_t.astype(jnp.bfloat16), w_in_bf, preferred_element_type=jnp.float32)
               + jnp.dot(h.astype(jnp.bfloat16), w_hh_bf, preferred_element_type=jnp.float32)
               + b)
        o = jnp.tanh(pre)
        return o, o

    _, ref_seq = jax.lax.scan(ref_step, h0, x_seq)

    assert out_seq.shape == (T, batch, hidden_size)
    assert out_step.shape == (batch, hidden_size)
    assert rnn_state is None
    assert neuron_hidden[0].shape == (0,)
    assert jnp.allclose(out_seq, ref_seq, atol=5e-3), "sequence mismatch vs reference"
    assert jnp.allclose(out_step, ref_seq[0], atol=5e-3), "single-step mismatch vs reference"
    print("KERNEL_OK")
</pallas_src>

<mosaic_0001>
module attributes {stable_mosaic.version = 11 : i64} {
  func.func @fused_rnn_seq_kernel(%arg0: i32, %arg1: memref<8x128xf32, #tpu.memory_space<vmem>>, %arg2: memref<1x8x128xbf16, #tpu.memory_space<vmem>>, %arg3: memref<128x128xbf16, #tpu.memory_space<vmem>>, %arg4: memref<128x128xbf16, #tpu.memory_space<vmem>>, %arg5: memref<1x128xf32, #tpu.memory_space<vmem>>, %arg6: memref<1x8x128xf32, #tpu.memory_space<vmem>>, %arg7: memref<8x128xf32, #tpu.memory_space<vmem>>) attributes {dimension_semantics = [#tpu.dimension_semantics<arbitrary>], iteration_bounds = array<i64: 8>, scalar_prefetch = 0 : i64, scratch_operands = 1 : i64, tpu.core_type = #tpu.core_type<tc>, window_params = [{pipeline_mode = #tpu.pipeline_mode<synchronous>, transform_indices = @transform_0, window_bounds = array<i64: 8, 128>}, {transform_indices = @transform_1, window_bounds = array<i64: 1, 8, 128>}, {pipeline_mode = #tpu.pipeline_mode<synchronous>, transform_indices = @transform_2, window_bounds = array<i64: 128, 128>}, {pipeline_mode = #tpu.pipeline_mode<synchronous>, transform_indices = @transform_3, window_bounds = array<i64: 128, 128>}, {pipeline_mode = #tpu.pipeline_mode<synchronous>, transform_indices = @transform_4, window_bounds = array<i64: 1, 128>}, {transform_indices = @transform_5, window_bounds = array<i64: 1, 8, 128>}]} {
    %c0_i32 = arith.constant 0 : i32
    %0 = arith.cmpi eq, %arg0, %c0_i32 : i32
    %1 = arith.extui %0 : i1 to i32
    %c0_i32_0 = arith.constant 0 : i32
    %2 = arith.cmpi ne, %1, %c0_i32_0 : i32
    scf.if %2 {
      %c0_17 = arith.constant 0 : index
      %c0_18 = arith.constant 0 : index
      %20 = vector.load %arg1[%c0_17, %c0_18] : memref<8x128xf32, #tpu.memory_space<vmem>>, vector<8x128xf32>
      %c0_19 = arith.constant 0 : index
      %c0_20 = arith.constant 0 : index
      %21 = vector.load %arg7[%c0_19, %c0_20] : memref<8x128xf32, #tpu.memory_space<vmem>>, vector<8x128xf32>
      tpu.vector_store %arg7[%c0_19, %c0_20], %20 {strides = array<i32>} : memref<8x128xf32, #tpu.memory_space<vmem>>, vector<8x128xf32>,
    } else {
    }
    %c0 = arith.constant 0 : index
    %c0_1 = arith.constant 0 : index
    %c0_2 = arith.constant 0 : index
    %3 = vector.load %arg2[%c0, %c0_1, %c0_2] : memref<1x8x128xbf16, #tpu.memory_space<vmem>>, vector<1x8x128xbf16>
    %4 = vector.shape_cast %3 : vector<1x8x128xbf16> to vector<8x128xbf16>
    %c0_3 = arith.constant 0 : index
    %c0_4 = arith.constant 0 : index
    %5 = vector.load %arg7[%c0_3, %c0_4] : memref<8x128xf32, #tpu.memory_space<vmem>>, vector<8x128xf32>
    %6 = arith.truncf %5 : vector<8x128xf32> to vector<8x128xbf16>
    %c0_5 = arith.constant 0 : index
    %c0_6 = arith.constant 0 : index
    %7 = vector.load %arg3[%c0_5, %c0_6] : memref<128x128xbf16, #tpu.memory_space<vmem>>, vector<128x128xbf16>
    %cst = arith.constant dense<0.000000e+00> : vector<8x128xf32>
    %8 = tpu.matmul %4, %7, %cst {dimension_numbers = #tpu.dot_dimension_numbers<[1], [0], [0], [1], [0, 0, 1, 1], [], []>} : vector<8x128xbf16>, vector<128x128xbf16>, vector<8x128xf32> -> vector<8x128xf32>
    %c0_7 = arith.constant 0 : index
    %c0_8 = arith.constant 0 : index
    %9 = vector.load %arg4[%c0_7, %c0_8] : memref<128x128xbf16, #tpu.memory_space<vmem>>, vector<128x128xbf16>
    %cst_9 = arith.constant dense<0.000000e+00> : vector<8x128xf32>
    %10 = tpu.matmul %6, %9, %cst_9 {dimension_numbers = #tpu.dot_dimension_numbers<[1], [0], [0], [1], [0, 0, 1, 1], [], []>} : vector<8x128xbf16>, vector<128x128xbf16>, vector<8x128xf32> -> vector<8x128xf32>
    %11 = arith.addf %8, %10 : vector<8x128xf32>
    %c0_10 = arith.constant 0 : index
    %c0_11 = arith.constant 0 : index
    %12 = vector.load %arg5[%c0_10, %c0_11] : memref<1x128xf32, #tpu.memory_space<vmem>>, vector<1x128xf32>
    %13 = vector.broadcast %12 : vector<1x128xf32> to vector<8x128xf32>
    %14 = arith.addf %11, %13 : vector<8x128xf32>
    %15 = math.tanh %14 : vector<8x128xf32>
    %c0_12 = arith.constant 0 : index
    %c0_13 = arith.constant 0 : index
    %c0_14 = arith.constant 0 : index
    %16 = vector.load %arg6[%c0_12, %c0_13, %c0_14] : memref<1x8x128xf32, #tpu.memory_space<vmem>>, vector<1x8x128xf32>
    %17 = vector.shape_cast %16 : vector<1x8x128xf32> to vector<8x128xf32>
    %18 = vector.shape_cast %15 : vector<8x128xf32> to vector<1x8x128xf32>
    tpu.vector_store %arg6[%c0_12, %c0_13, %c0_14], %18 {strides = array<i32>} : memref<1x8x128xf32, #tpu.memory_space<vmem>>, vector<1x8x128xf32>,
    %c0_15 = arith.constant 0 : index
    %c0_16 = arith.constant 0 : index
    %19 = vector.load %arg7[%c0_15, %c0_16] : memref<8x128xf32, #tpu.memory_space<vmem>>, vector<8x128xf32>
    tpu.vector_store %arg7[%c0_15, %c0_16], %15 {strides = array<i32>} : memref<8x128xf32, #tpu.memory_space<vmem>>, vector<8x128xf32>,
    return
  }
  func.func @transform_0(%arg0: i32) -> (i32, i32) {
    %c0_i32 = arith.constant 0 : i32
    %c0_i32_0 = arith.constant 0 : i32
    %c0_i32_1 = arith.constant 0 : i32
    return %c0_i32, %c0_i32_0 : i32, i32
  }
  func.func @transform_1(%arg0: i32) -> (i32, i32, i32) {
    %c0_i32 = arith.constant 0 : i32
    %c0_i32_0 = arith.constant 0 : i32
    %c0_i32_1 = arith.constant 0 : i32
    return %arg0, %c0_i32, %c0_i32_0 : i32, i32, i32
  }
  func.func @transform_2(%arg0: i32) -> (i32, i32) {
    %c0_i32 = arith.constant 0 : i32
    %c0_i32_0 = arith.constant 0 : i32
    %c0_i32_1 = arith.constant 0 : i32
    return %c0_i32, %c0_i32_0 : i32, i32
  }
  func.func @transform_3(%arg0: i32) -> (i32, i32) {
    %c0_i32 = arith.constant 0 : i32
    %c0_i32_0 = arith.constant 0 : i32
    %c0_i32_1 = arith.constant 0 : i32
    return %c0_i32, %c0_i32_0 : i32, i32
  }
  func.func @transform_4(%arg0: i32) -> (i32, i32) {
    %c0_i32 = arith.constant 0 : i32
    %c0_i32_0 = arith.constant 0 : i32
    %c0_i32_1 = arith.constant 0 : i32
    return %c0_i32, %c0_i32_0 : i32, i32
  }
  func.func @transform_5(%arg0: i32) -> (i32, i32, i32) {
    %c0_i32 = arith.constant 0 : i32
    %c0_i32_0 = arith.constant 0 : i32
    %c0_i32_1 = arith.constant 0 : i32
    return %arg0, %c0_i32, %c0_i32_0 : i32, i32, i32
  }
}

</mosaic_0001>

<bundles_post_ra>
// kernel: model_layer_sequence_forward.1
= control target key start
LH: loop header
LB: loop body
LE: loop exit
PB: predicated region body
PF: predicated region fallthrough
CT: control target
= control target key end

     0   :  { %10 = vsyncpa [#allocation4], 0  ;;  %s847_s0 = inlined_call_operand.vmem [shape: f32[8,128], index: 0, kind: input, shape index: {}]   ;;  %s848_s1 = inlined_call_operand.vmem [shape: bf16[8,8,128], index: 1, kind: input, shape index: {}]   ;;  %s849_s2 = inlined_call_operand.vmem [shape: bf16[128,128], index: 2, kind: input, shape index: {}]   ;;  %s850_s3 = inlined_call_operand.vmem [shape: bf16[128,128], index: 3, kind: input, shape index: {}]   ;;  %s851_s4 = inlined_call_operand.vmem [shape: f32[1,128], index: 4, kind: input, shape index: {}]   ;;  %s852_s5 = inlined_call_operand.hbm [shape: f32[8,8,128], index: 5, kind: output, shape index: {}]  }
   0x1   :  { %12 = vsyncpa [#allocation4 + $0x1], 0  ;;  %s693_s18 = smov 0   ;;  %s695_s19 = smov 0  }
   0x2   :  { %s697_s20 = smov 0   ;;  %s699_s21 = smov 0  }
   0x3 LB: > { %s714_s22 = sadd.s32 4294967295, %s661_s21   ;;  %s466_s23 = sadd.s32 4294967294, %s661_s21   ;;  %s661_s21 = sphi %s699_s21, %s858_s21   ;;  %s657_s20 = sphi %s697_s20, %s857_s20   ;;  %s653_s19 = sphi %s695_s19, %s856_s19   ;;  %s649_s18 = sphi %s693_s18, %s855_s18  }
   0x4   : > { %s718_s24 = sadd.s32 1, %s661_s21   ;;  %s135_s25 = sadd.s32 1, %s657_s20 }
   0x5   : > { %s132_s26 = ssub.s32 %s661_s21, %s718_s24  ;;  %p145_p0 = scmp.ne.s32.totalorder %s657_s20, %s653_s19 }
   0x6   : > { %p133_p1 = scmp.eq.s32.totalorder %s132_s26, 0  ;;  %p146_p2 = scmp.eq.s32.totalorder %s714_s22, 7 }
   0x7   : > { %p151_p3 = scmp.ne.s32.totalorder %s653_s19, %s649_s18  ;;  %p152_p4 = scmp.eq.s32.totalorder %s466_s23, 7 }
   0x8   : > { %s729_s27 = scalar_select %p133_p1, %s657_s20, %s135_s25  }
   0x9   : > { %p731_p5 = por %p146_p2, %p145_p0  ;;  %p735_p6 = por %p152_p4, %p151_p3 }
   0xa   : > { %p469_p7 = scmp.ge.s32.totalorder %s661_s21, 1  ;;  %p189_p8 = scmp.lt.s32.totalorder %s661_s21, 9 }
   0xc   : > { %p190_p9 = pnand %p469_p7, %p189_p8 }
   0xd   : > { %s213_s30 = sand.u32 (!%p190_p9), 1, %s653_s19   ;;  %p216_p10 = scmp.lt.s32.totalorder (!%p190_p9), %s714_s22, 7 }
   0xe   : > { %193 = sbr.rel (%p190_p9) target bundleno = 201 (0xc9), region = 40  ;;  %s745_s6 = sshll.u32 (!%p190_p9), %s213_s30, 3 }
   0xf   : > { %s215_s12 = scalar_lea.vmem (!%p190_p9), [#allocation3], %s745_s6  ;;  %p472_p11 = scmp.ne.s32.totalorder (!%p190_p9), %s714_s22, 0 }
  0x13   : > { %s217_s7 = scalar_select %p216_p10, %s714_s22, 7 }
  0x14   : > { %223 = sbr.rel (%p472_p11) target bundleno = 27 (0x1b), region = 44 }
  0x15   : > { %s471_s8 = sshll.u32 %s217_s7, 2 }
  0x16   : > { %s751_s11 = scalar_lea.vmem %s848_s1, %s471_s8 }
  0x19   : > { %v224_v0 = vld [vmem:[%s847_s0] sm:$0xff] }
  0x1a   : > { %225 = vst [vmem:[#allocation2] sm:$0xff] %v224_v0 }
  0x1b PF: > { %v556_v1 = vld [vmem:[%s850_s3 + $0x38] sm:$0xff]  ;;  %v555_v3 = vld [vmem:[%s850_s3 + $0x30] sm:$0xff]  ;;  %v554_v5 = vld [vmem:[%s850_s3 + $0x28] sm:$0xff]  ;;  %s538_s13 = sshll.u32 %s714_s22, 3  ;;  %s392_s22 = scalar_lea.sflag [#allocation4], %s213_s30 }
  0x1c   : > { %v548_v2 = vld [vmem:[%s849_s2 + $0x38] sm:$0xff]  ;;  %309 = vmatpush.bf16.msra.mxu0 %v556_v1  ;;  %v547_v4 = vld [vmem:[%s849_s2 + $0x30] sm:$0xff]  ;;  %v546_v6 = vld [vmem:[%s849_s2 + $0x28] sm:$0xff]  ;;  %s402_s16 = scalar_lea.hbm %s852_s5, %s538_s13  ;;  %s619_s8 = scalar_lea.hbm %s852_s5, 64 }
  0x1d   : > { %370 = vmatpush.bf16.msra.mxu1 %v548_v2  ;;  %v553_v7 = vld [vmem:[%s850_s3 + $0x20] sm:$0xff]  ;;  %v552_v9 = vld [vmem:[%s850_s3 + $0x18] sm:$0xff]  ;;  %v551_v11 = vld [vmem:[%s850_s3 + $0x10] sm:$0xff]  ;;  %s406_s17 = sshll.u32 %s402_s16, 4  ;;  %s407_s17 = int_to_ptr.hbm [resolvable:$true] %s406_s17 }
  0x1e   : > { %v545_v8 = vld [vmem:[%s849_s2 + $0x20] sm:$0xff]  ;;  %v544_v10 = vld [vmem:[%s849_s2 + $0x18] sm:$0xff]  ;;  %v543_v12 = vld [vmem:[%s849_s2 + $0x10] sm:$0xff]  ;;  %s613_s23 = sshra.s32 %s407_s17, 4  ;;  %s614_s23 = int_to_ptr.hbm [resolvable:$true] %s613_s23 }
  0x1f   : > { %v550_v13 = vld [vmem:[%s850_s3 + $0x8] sm:$0xff]  ;;  %v549_v15 = vld [vmem:[%s850_s3] sm:$0xff]  ;;  %s615_s25 = scalar_lea.hbm %s614_s23, 8  ;;  %p620_p1 = scmp.lt.s32.totalorder %s614_s23, %s852_s5 }
  0x20   : > { %310 = vmatpush.bf16.msra.mxu0 %v555_v3  ;;  %v542_v14 = vld [vmem:[%s849_s2 + $0x8] sm:$0xff]  ;;  %v541_v16 = vld [vmem:[%s849_s2] sm:$0xff]  ;;  %p616_p12 = scmp.ne.s32.totalorder %s614_s23, %s615_s25  ;;  %p621_p2 = scmp.lt.s32.totalorder %s619_s8, %s615_s25 }
  0x21   : > { %371 = vmatpush.bf16.msra.mxu1 %v547_v4  ;;  %v227_v17 = vld [vmem:[#allocation2] sm:$0xff] }
  0x22   : > { %v228_v18 = vpack.c.bf16 %v227_v17, %v227_v17  ;;  %v226_v19 = vld [vmem:[%s751_s11] sm:$0xf]  ;;  %s404_s11 = sshll.u32 %s215_s12, 4  ;;  %p617_p13 = pnand %p616_p12, %p731_p5  ;;  %s405_s11 = int_to_ptr.vmem [resolvable:$true] %s404_s11 }
  0x23   : > { %v596_v20 = vld [vmem:[%s851_s4] ss:$0 sm:$0xff]  ;;  %p622_p3 = por %p621_p2, %p620_p1 }
  0x24   : > { %311 = vmatpush.bf16.msra.mxu0 %v554_v5  ;;  %p618_p0 = pneg %p617_p13 }
  0x25   : > { %372 = vmatpush.bf16.msra.mxu1 %v546_v6 }
  0x26   : > { %p623_p4 = pnand %p622_p3, %p618_p0 }
  0x28   : > { %312 = vmatpush.bf16.msra.mxu0 %v553_v7 }
  0x29   : > { %373 = vmatpush.bf16.msra.mxu1 %v545_v8 }
  0x2c   : > { %313 = vmatpush.bf16.msra.mxu0 %v552_v9 }
  0x2d   : > { %374 = vmatpush.bf16.msra.mxu1 %v544_v10 }
  0x30   : > { %314 = vmatpush.bf16.msra.mxu0 %v551_v11 }
  0x31   : > { %375 = vmatpush.bf16.msra.mxu1 %v543_v12 }
  0x34   : > { %315 = vmatpush.bf16.msra.mxu0 %v550_v13 }
  0x35   : > { %376 = vmatpush.bf16.msra.mxu1 %v542_v14 }
  0x38   : > { %316 = vmatpush.bf16.msra.mxu0 %v549_v15 }
  0x39   : > { %377 = vmatpush.bf16.msra.mxu1 %v541_v16 }
  0x3b   : > { %317 = vmatmul.bf16.vlgmr.msra.gmra.mxu0 %v228_v18 }
  0x3c   : > { %378 = vmatmul.bf16.vlgmr.msra.gmra.mxu1 %v226_v19 }
  0xb8   : > { %v318_v21 = vpop.f32.mrf.mxu0 }
  0xb9   : > { %v379_v22 = vpop.f32.mrf.mxu1 }
  0xba   : > { %v380_v23 = vadd.f32 %v379_v22, %v318_v21 }
  0xbc   : > { %v387_v24 = vadd.f32 %v596_v20, %v380_v23 }
  0xbe   : > { %597 = vtanh.f32 %v387_v24 }
  0xc0   : > { %v320_v25 = vpop.f32.mrf.mxu0 }
  0xc1   : > { %v381_v26 = vpop.f32.mrf.mxu1 }
  0xc4   : > { %v598_v27 = vpop.eup %597 }
  0xc5   : > { %390 = vst [vmem:[#allocation2] sm:$0xff] %v598_v27 }
  0xc6   : > { %389 = vst [vmem:[%s215_s12] sm:$0xff] %v598_v27 }
  0xc7   : > { %626 = shalt.err (!%p623_p4)
}
  0xc8   : > { %557 = dma.vmem_to_hbm [thread:$0]  (%p731_p5), %s405_s11, 128, %s407_s17, %s392_s22  }
  0xc9 PF: > { %p563_p7 = scmp.ge.s32.totalorder %s661_s21, 2  ;;  %s418_s30 = sand.u32 1, %s649_s18  }
  0xca   : > { %s419_s6 = scalar_lea.sflag [#allocation4], %s418_s30 }
  0xcb   : > { %p560_p8 = pnand %p563_p7, %p735_p6 }
  0xcd   : > { %p561_p9 = pneg %p560_p8 }
  0xcf   : > { %644 = dma.done.wait (%p561_p9), %s419_s6, 128  }
  0xd0   : > { %646 = vsyncadd (%p561_p9), %s419_s6, 4294967168  ;;  %p15_p10 = scmp.ge.s32.totalorder %s718_s24, 10   ;;  %s855_s18 = smov %s653_s19 }
  0xd1   : > { %s856_s19 = smov %s657_s20  ;;  %s857_s20 = smov %s729_s27 }
  0xd2   : > { %s858_s21 = smov %s718_s24  ;;  %17 = sbr.rel (!%p15_p10) target bundleno = 3 (0x3), region = 79 }
  0xd7   :  { %425 = vsyncpa [#allocation4], 1 }
  0xd8   :  { %427 = vsyncpa [#allocation4 + $0x1], 1 }

</bundles_post_ra>
